<compile_context>
chip_gen: v7x
topology: tpu7x:2x2x1
jax: 0.10.0
libtpu: 0.0.40
codegen_flags: <defaults>
</compile_context>

<pallas_src>
import jax
import jax.numpy as jnp
from jax.experimental import pallas as pl
from jax.experimental.pallas import tpu as pltpu


# Below this many pixel rows (or below 128 channels), a fused XLA einsum beats
# kernel launch / DMA setup and vreg-lane utilization.
_MIN_PIXELS_FOR_PALLAS = 4096
_MIN_CHANNELS_FOR_PALLAS = 128


def _round_up(x, m):
    return ((x + m - 1) // m) * m


def _vmem_budget():
    """Generation-aware (limit, tile_budget) in bytes."""
    try:
        cap = int(pltpu.get_tpu_info().vmem_capacity_bytes)
    except Exception:  # no device / older API -> be conservative (v7x-sized)
        cap = 64 * 1024 * 1024
    # ~3/4 of physical VMEM, capped at 100 MiB (v5e/v6e: 96 MiB, v7x: 48 MiB).
    limit = min((cap * 3) // 4, 100 * 1024 * 1024)
    limit = max(limit, 16 * 1024 * 1024)
    tile_budget = (limit * 17) // 20  # ~85% of the scoped limit for our tiles
    return limit, tile_budget


def _pick_tiles(B, HW, C, N, x_itemsize, out_itemsize, budget):
    """Choose (tile_b, tile_hw): biggest tiles fitting the VMEM budget, while
    keeping >= 2 grid steps whenever the problem has enough work so v7x's two
    TensorCores both get a share of the 'parallel' grid."""
    hw_cap = HW if HW < 128 else _round_up(HW, 128)
    thw_cands = sorted(
        {t for t in (8192, 4096, 2048, 1024, 512, 256, 128) if t <= hw_cap}
        | {hw_cap},
        reverse=True,
    )
    # Resident weight + bias, conservatively counted double-buffered.
    resident = 2 * (N * C * x_itemsize + N * 4)
    max_steps = B * pl.cdiv(HW, thw_cands[-1])
    fallback = (1, thw_cands[-1])
    for thw in thw_cands:
        for bb in (8, 4, 2, 1):
            if bb > B or (B % bb) != 0:
                continue
            need = (resident
                    + 2 * bb * thw * C * x_itemsize       # double-buffered x tile
                    + 2 * bb * N * thw * out_itemsize)    # double-buffered out tile
            if need > budget:
                continue
            steps = (B // bb) * pl.cdiv(HW, thw)
            if steps < 2 and max_steps >= 2:
                continue  # force >= 2 steps so both v7x TCs run
            return bb, thw
    return fallback


def _conv1x1_kernel(x_ref, w_ref, b_ref, o_ref):
    """One (batch-tile, pixel-tile) block of the 1x1-conv-as-matmul.

    x_ref: (bb, thw, C)  streamed pixel tile(s)
    w_ref: (N, C)        resident weight (Conv2d 1x1 kernel, squeezed)
    b_ref: (N, 1)        resident bias (f32)
    o_ref: (bb, N, thw)  lane-dense output block (pixels on the lane axis)
    """
    w = w_ref[...]
    bvec = b_ref[...]  # (N, 1) f32
    bb = x_ref.shape[0]
    for bi in range(bb):  # static unroll; bb is small (<= 8)
        acc = jax.lax.dot_general(
            w, x_ref[bi],
            dimension_numbers=(((1,), (1,)), ((), ())),   # contract over C
            preferred_element_type=jnp.float32,
        )                                                  # (N, thw) f32
        o_ref[bi] = (acc + bvec).astype(o_ref.dtype)


def linear_classifier_forward(embeddings, weight, bias, token_h, token_w, *,
                              out_dtype=None, use_pallas=None,
                              tile_b=None, tile_hw=None):
    """LinearClassifier forward: 1x1 Conv2d over NHWC tokens, returns NCHW.

    embeddings: (..., C), reshapeable to (-1, token_h, token_w, C)
    weight:     (num_labels, C)  -- the Conv2d (1,1) kernel squeezed
    bias:       (num_labels,)
    returns:    (B, num_labels, token_h, token_w)  (matches PyTorch output)
    """
    C = embeddings.shape[-1]
    N = weight.shape[0]
    if out_dtype is None:
        out_dtype = embeddings.dtype

    HW = token_h * token_w
    x = embeddings.reshape(-1, HW, C)   # (B, HW, C) -- free reshape
    B = x.shape[0]
    M = B * HW

    if use_pallas is None:
        use_pallas = (M >= _MIN_PIXELS_FOR_PALLAS) and (C >= _MIN_CHANNELS_FOR_PALLAS)

    if not use_pallas:
        # Tiny-problem / small-channel fallback: fused XLA einsum, same math.
        xb = x.reshape(B, token_h, token_w, C)
        out = jnp.einsum("bhwc,nc->bnhw", xb, weight,
                         preferred_element_type=jnp.float32)
        out = out + bias.astype(jnp.float32)[None, :, None, None]
        return out.astype(out_dtype)

    # Cast only the tiny weight to the activation dtype (never the big input).
    w2d = weight if weight.dtype == x.dtype else weight.astype(x.dtype)
    b2d = bias.astype(jnp.float32).reshape(N, 1)

    vmem_limit, tile_budget = _vmem_budget()
    auto_bb, auto_thw = _pick_tiles(
        B, HW, C, N,
        jnp.dtype(x.dtype).itemsize, jnp.dtype(out_dtype).itemsize,
        tile_budget)
    bb = tile_b if tile_b is not None else auto_bb
    thw = tile_hw if tile_hw is not None else auto_thw
    assert bb >= 1, "batch tile must be >= 1"
    assert thw == HW or thw % 128 == 0, \
        "pixel tile must be lane-aligned (multiple of 128) or the full H*W"

    grid = (pl.cdiv(B, bb), pl.cdiv(HW, thw))  # ragged tails masked by Pallas

    out = pl.pallas_call(
        _conv1x1_kernel,
        out_shape=jax.ShapeDtypeStruct((B, N, HW), out_dtype),
        grid_spec=pltpu.PrefetchScalarGridSpec(
            num_scalar_prefetch=0,
            grid=grid,
            in_specs=[
                pl.BlockSpec((bb, thw, C), lambda i, j: (i, j, 0)),  # pixels
                pl.BlockSpec((N, C), lambda i, j: (0, 0)),           # weight
                pl.BlockSpec((N, 1), lambda i, j: (0, 0)),           # bias
            ],
            out_specs=pl.BlockSpec((bb, N, thw), lambda i, j: (i, 0, j)),
        ),
        compiler_params=pltpu.CompilerParams(
            dimension_semantics=("parallel", "parallel"),
            vmem_limit_bytes=vmem_limit,
        ),
    )(x, w2d, b2d)

    # (B, N, HW) -> (B, N, H, W): pure minor-axis split, no HBM transpose pass.
    return out.reshape(B, N, token_h, token_w)


if __name__ == "__main__":
    # Small shapes consistent with the module (tokenW=tokenH=27 are defaults).
    batch = 2
    in_channels = 128          # >= 128 so the Pallas path is the efficient route
    token_h = 27
    token_w = 27
    num_labels = 4

    key = jax.random.PRNGKey(0)
    k_x, k_w, k_b = jax.random.split(key, 3)

    # Usual usage: (B, num_tokens, C) embeddings.
    x = jax.random.normal(k_x, (batch, token_h * token_w, in_channels),
                          dtype=jnp.float32)
    weight = jax.random.normal(k_w, (num_labels, in_channels),
                               dtype=jnp.float32) * 0.02
    bias = jax.random.normal(k_b, (num_labels,), dtype=jnp.float32) * 0.5

    # Reference: same math as PyTorch NHWC->NCHW permute + Conv2d 1x1.
    x_bhwc = x.reshape(-1, token_h, token_w, in_channels)
    ref = jnp.einsum("bhwc,nc->bnhw", x_bhwc, weight,
                     precision=jax.lax.Precision.HIGHEST) \
        + bias[None, :, None, None]
    # Tolerance covers possible bf16-pass matmul decompositions (XLA vs Mosaic)
    # for f32 inputs; real bugs (missing bias / wrong layout) are >> this.
    TOL = dict(atol=2e-3, rtol=2e-3)

    # 1) Forced Pallas path, auto-picked tiles (HW=729 -> one padded 768-wide
    #    pixel block, >= 2 batch steps on the parallel grid).
    out = linear_classifier_forward(x, weight, bias, token_h, token_w,
                                    use_pallas=True)
    out = jax.block_until_ready(out)
    assert out.shape == (batch, num_labels, token_h, token_w)
    assert jnp.allclose(out, ref, **TOL), float(jnp.max(jnp.abs(out - ref)))

    # 2) Small explicit tiles: multi-step 2-D grid with a ragged pixel tail
    #    (729 % 128 != 0) exercising masked partial output stores.
    out2 = linear_classifier_forward(x, weight, bias, token_h, token_w,
                                     use_pallas=True, tile_b=1, tile_hw=128)
    out2 = jax.block_until_ready(out2)
    assert jnp.allclose(out2, ref, **TOL), float(jnp.max(jnp.abs(out2 - ref)))

    # 3) Small-channel probe (C=32 < 128): heuristic routes to the fused einsum
    #    fallback (the kernel would waste 3/4 of each vreg's lanes).
    c_small = 32
    x_small = jax.random.normal(k_x, (batch, token_h * token_w, c_small),
                                dtype=jnp.float32)
    w_small = jax.random.normal(k_w, (num_labels, c_small),
                                dtype=jnp.float32) * 0.02
    ref_small = jnp.einsum("bhwc,nc->bnhw",
                           x_small.reshape(-1, token_h, token_w, c_small),
                           w_small, precision=jax.lax.Precision.HIGHEST) \
        + bias[None, :, None, None]
    out3 = linear_classifier_forward(x_small, w_small, bias, token_h, token_w)
    out3 = jax.block_until_ready(out3)
    assert out3.shape == (batch, num_labels, token_h, token_w)
    assert jnp.allclose(out3, ref_small, **TOL)

    print("KERNEL_OK")
</pallas_src>

<mosaic_0001>
module attributes {stable_mosaic.version = 11 : i64} {
  func.func @_conv1x1_kernel(%arg0: i32, %arg1: i32, %arg2: memref<1x768x128xf32, #tpu.memory_space<vmem>>, %arg3: memref<4x128xf32, #tpu.memory_space<vmem>>, %arg4: memref<4x1xf32, #tpu.memory_space<vmem>>, %arg5: memref<1x4x768xf32, #tpu.memory_space<vmem>>) attributes {dimension_semantics = [#tpu.dimension_semantics<parallel>, #tpu.dimension_semantics<parallel>], iteration_bounds = array<i64: 2, 1>, scalar_prefetch = 0 : i64, scratch_operands = 0 : i64, tpu.core_type = #tpu.core_type<tc>, window_params = [{transform_indices = @transform_0, window_bounds = array<i64: 1, 768, 128>}, {pipeline_mode = #tpu.pipeline_mode<synchronous>, transform_indices = @transform_1, window_bounds = array<i64: 4, 128>}, {pipeline_mode = #tpu.pipeline_mode<synchronous>, transform_indices = @transform_2, window_bounds = array<i64: 4, 1>}, {transform_indices = @transform_3, window_bounds = array<i64: 1, 4, 768>}]} {
    %c0 = arith.constant 0 : index
    %c0_0 = arith.constant 0 : index
    %0 = vector.load %arg3[%c0, %c0_0] : memref<4x128xf32, #tpu.memory_space<vmem>>, vector<4x128xf32>
    %c0_1 = arith.constant 0 : index
    %c0_2 = arith.constant 0 : index
    %1 = vector.load %arg4[%c0_1, %c0_2] : memref<4x1xf32, #tpu.memory_space<vmem>>, vector<4x1xf32>
    %c0_3 = arith.constant 0 : index
    %c0_4 = arith.constant 0 : index
    %c0_5 = arith.constant 0 : index
    %2 = vector.load %arg2[%c0_3, %c0_4, %c0_5] : memref<1x768x128xf32, #tpu.memory_space<vmem>>, vector<1x768x128xf32>
    %3 = vector.shape_cast %2 : vector<1x768x128xf32> to vector<768x128xf32>
    %cst = arith.constant dense<0.000000e+00> : vector<4x768xf32>
    %4 = tpu.matmul %0, %3, %cst {dimension_numbers = #tpu.dot_dimension_numbers<[1], [1], [0], [0], [0, 0, 1, 0], [], []>} : vector<4x128xf32>, vector<768x128xf32>, vector<4x768xf32> -> vector<4x768xf32>
    %5 = vector.broadcast %1 : vector<4x1xf32> to vector<4x768xf32>
    %6 = arith.addf %4, %5 : vector<4x768xf32>
    %c0_6 = arith.constant 0 : index
    %c0_7 = arith.constant 0 : index
    %c0_8 = arith.constant 0 : index
    %7 = vector.load %arg5[%c0_6, %c0_7, %c0_8] : memref<1x4x768xf32, #tpu.memory_space<vmem>>, vector<1x4x768xf32>
    %8 = vector.shape_cast %7 : vector<1x4x768xf32> to vector<4x768xf32>
    %9 = vector.shape_cast %6 : vector<4x768xf32> to vector<1x4x768xf32>
    tpu.vector_store %arg5[%c0_6, %c0_7, %c0_8], %9 {strides = array<i32>} : memref<1x4x768xf32, #tpu.memory_space<vmem>>, vector<1x4x768xf32>,
    return
  }
  func.func @transform_0(%arg0: i32, %arg1: i32) -> (i32, i32, i32) {
    %c0_i32 = arith.constant 0 : i32
    %c0_i32_0 = arith.constant 0 : i32
    return %arg0, %arg1, %c0_i32 : i32, i32, i32
  }
  func.func @transform_1(%arg0: i32, %arg1: i32) -> (i32, i32) {
    %c0_i32 = arith.constant 0 : i32
    %c0_i32_0 = arith.constant 0 : i32
    %c0_i32_1 = arith.constant 0 : i32
    return %c0_i32, %c0_i32_0 : i32, i32
  }
  func.func @transform_2(%arg0: i32, %arg1: i32) -> (i32, i32) {
    %c0_i32 = arith.constant 0 : i32
    %c0_i32_0 = arith.constant 0 : i32
    %c0_i32_1 = arith.constant 0 : i32
    return %c0_i32, %c0_i32_0 : i32, i32
  }
  func.func @transform_3(%arg0: i32, %arg1: i32) -> (i32, i32, i32) {
    %c0_i32 = arith.constant 0 : i32
    %c0_i32_0 = arith.constant 0 : i32
    return %arg0, %c0_i32, %arg1 : i32, i32, i32
  }
}

</mosaic_0001>

<bundles_post_ra>
// kernel: tpu_custom_call.1
= control target key start
LH: loop header
LB: loop body
LE: loop exit
PB: predicated region body
PF: predicated region fallthrough
CT: control target
= control target key end

     0   :  { %8 = vsyncpa [#allocation3], 0  ;;  %s1227_s0 = inlined_call_operand.vmem [shape: f32[2,729,128], index: 0, kind: input, shape index: {}]   ;;  %s1228_s1 = inlined_call_operand.vmem [shape: f32[4,128], index: 1, kind: input, shape index: {}]   ;;  %s1229_s2 = inlined_call_operand.vmem [shape: f32[4,1], index: 2, kind: input, shape index: {}]   ;;  %s1230_s3 = inlined_call_operand.hbm [shape: f32[2,4,729], index: 3, kind: output, shape index: {}]  }
   0x1   :  { %10 = vsyncpa [#allocation3 + $0x1], 0  ;;  %s1003_s12 = smov 0   ;;  %s1005_s13 = smov 0  }
   0x2   :  { %s1007_s14 = smov 0   ;;  %s1009_s15 = smov 0  }
   0x3   :  { %s1011_s16 = smov 0   ;;  %s1013_s17 = smov 0  }
   0x4 LB: > { %s634_s18 = sadd.s32 4294967295, %s979_s17   ;;  %s635_s19 = sadd.s32 4294967294, %s979_s17   ;;  %s979_s17 = sphi %s1013_s17, %s16_s17   ;;  %s975_s16 = sphi %s1011_s16, %s1237_s16   ;;  %s971_s15 = sphi %s1009_s15, %s1236_s15   ;;  %s967_s14 = sphi %s1007_s14, %s1235_s14   ;;  %s963_s13 = sphi %s1005_s13, %s1234_s13   ;;  %s959_s12 = sphi %s1003_s12, %s1233_s12  }
   0x5   : > { %s28_s20 = sadd.s32 1, %s975_s16  ;;  %s107_s21 = sadd.s32 1, %s967_s14 }
   0x6   : > { %p30_p0 = scmp.ge.s32.totalorder %s28_s20, 2  ;;  %p117_p1 = scmp.ne.s32.totalorder %s967_s14, %s963_s13 }
   0x7   : > { %p118_p2 = scmp.eq.s32.totalorder %s634_s18, 1  ;;  %p123_p3 = scmp.ne.s32.totalorder %s963_s13, %s959_s12 }
   0x8   : > { %s1239_s20 = smov (%p30_p0, %s28_s20), 0  ;;  %p124_p5 = scmp.eq.s32.totalorder %s635_s19, 1 }
   0x9   : > { %p1043_p4 = por %p118_p2, %p117_p1  ;;  %s102_s23 = ssub.s32 %s975_s16, %s1239_s20 }
   0xa   : > { %p638_p6 = scmp.ge.s32.totalorder %s979_s17, 1  ;;  %p105_p7 = scmp.eq.s32.totalorder %s102_s23, 0 }
   0xb   : > { %p1050_p8 = por %p124_p5, %p123_p3  ;;  %p165_p9 = scmp.lt.s32.totalorder %s979_s17, 3 }
   0xc   : > { %s1056_s25 = scalar_select %p105_p7, %s967_s14, %s107_s21  }
   0xd   : > { %p166_p10 = pnand %p638_p6, %p165_p9 }
   0xe   : > { %p198_p11 = scmp.lt.s32.totalorder (!%p166_p10), %s971_s15, 1  ;;  %v1062_v0 = vld [vmem:[%s1228_s1] sm:$0xf] (!%p166_p10)  ;;  %v981_v10 = vmov (!%p166_p10), 0   ;;  %s192_s8 = sand.u32 (!%p166_p10), 1, %s963_s13  }
   0xf   : > { %169 = sbr.rel (%p166_p10) target bundleno = 389 (0x185), region = 32  ;;  %675 = vmatprep.mubr.f32.mxu0 (!%p166_p10), %v1062_v0  ;;  %709 = vmatprep.mubr.f32.mxu1 (!%p166_p10), %v1062_v0  ;;  %v211_v57 = vld [vmem:[%s1229_s2] sm:$0xf] (!%p166_p10)  ;;  %s542_s26 = scalar_lea.sflag (!%p166_p10), [#allocation3], %s192_s8 }
  0x10   : > { %900 = vset.pattern.permute.xlu0 (!%p166_p10), %v981_v10  ;;  %s841_s9 = smul.u32 (!%p166_p10), 24, %s192_s8 }
  0x11   : > { %310 = vperm.xlu0 (!%p166_p10), %900, %v211_v57   ;;  %s843_s11 = smul.u32 (!%p166_p10), 384, %s971_s15 }
  0x12   : > { %s194_s10 = scalar_lea.vmem (!%p166_p10), [#allocation2], %s841_s9 }
  0x13   : > { %s558_s18 = sshll.u32 (!%p166_p10), %s194_s10, 4  ;;  %s1180_s23 = scalar_lea.hbm (!%p166_p10), %s1230_s3, %s843_s11  ;;  %s1182_s18 = int_to_ptr.vmem [resolvable:$true] %s558_s18 }
  0x14   : > { %s901_s27 = scalar_lea.vmem (!%p166_p10), %s1182_s18, 384 }
  0x15   : > { %p902_p12 = scmp.ne.s32.totalorder (!%p166_p10), %s1182_s18, %s901_s27 }
  0x16   : > { %s199_s28 = scalar_select %p198_p11, %s971_s15, 1 }
  0x17   : > { %p903_p13 = pnand %p902_p12, %p1043_p4  ;;  %s982_s15 = smov [#allocation2]  }
  0x18   : > { %s842_s29 = smul.u32 736, %s199_s28  ;;  %s905_s28 = sshll.u32 %s982_s15, 4  ;;  %s906_s28 = int_to_ptr.vmem [resolvable:$false] %s905_s28 }
  0x19   : > { %p904_p0 = pneg %p903_p13  ;;  %p908_p1 = scmp.lt.s32.totalorder %s1182_s18, %s906_s28 }
  0x1a   : > { %s1070_s5 = scalar_lea.vmem %s1227_s0, %s842_s29  ;;  %s907_s29 = scalar_lea.vmem %s906_s28, 768 }
  0x1b   : > { %v228_v1 = vld [vmem:[%s1070_s5 + $0x80] sm:$0xff]  ;;  %v229_v2 = vld [vmem:[%s1070_s5 + $0x88] sm:$0xff]  ;;  %v230_v6 = vld [vmem:[%s1070_s5 + $0x90] sm:$0xff]  ;;  %p909_p2 = scmp.lt.s32.totalorder %s907_s29, %s901_s27 }
  0x1c   : > { %v212_v3 = vld [vmem:[%s1070_s5] sm:$0xff]  ;;  %v745_v4 = vpack.c.bf16 %v229_v2, %v228_v1  ;;  %v213_v5 = vld [vmem:[%s1070_s5 + $0x8] sm:$0xff]  ;;  %v231_v7 = vld [vmem:[%s1070_s5 + $0x98] sm:$0xff] }
  0x1d   : > { %v747_v8 = vpack.c.bf16 %v213_v5, %v212_v3  ;;  %v749_v9 = vpack.c.bf16 %v231_v7, %v230_v6  ;;  %v214_v11 = vld [vmem:[%s1070_s5 + $0x10] sm:$0xff]  ;;  %v215_v12 = vld [vmem:[%s1070_s5 + $0x18] sm:$0xff]  ;;  %v232_v13 = vld [vmem:[%s1070_s5 + $0xa0] sm:$0xff]  ;;  %p910_p3 = por %p909_p2, %p908_p1 }
  0x1e   : > { %746 = vmatprep.subr.bf16.mxu0 %v745_v4  ;;  %v233_v14 = vld [vmem:[%s1070_s5 + $0xa8] sm:$0xff]  ;;  %v751_v15 = vpack.c.bf16 %v215_v12, %v214_v11  ;;  %v260_v17 = vld [vmem:[%s1070_s5 + $0x180] sm:$0xff]  ;;  %v262_v25 = vld [vmem:[%s1070_s5 + $0x190] sm:$0xff] }
  0x1f   : > { %748 = vmatpush3.bf16.xpose.msra.mxu0 %v747_v8  ;;  %v753_v16 = vpack.c.bf16 %v233_v14, %v232_v13  ;;  %v261_v18 = vld [vmem:[%s1070_s5 + $0x188] sm:$0xff]  ;;  %v244_v19 = vld [vmem:[%s1070_s5 + $0x100] sm:$0xff]  ;;  %v263_v26 = vld [vmem:[%s1070_s5 + $0x198] sm:$0xff]  ;;  %p911_p5 = pnand %p910_p3, %p904_p0 }
  0x20   : > { %750 = vmatprep.subr.bf16.mxu0 %v749_v9  ;;  %v245_v20 = vld [vmem:[%s1070_s5 + $0x108] sm:$0xff]  ;;  %v216_v21 = vld [vmem:[%s1070_s5 + $0x20] sm:$0xff]  ;;  %v777_v22 = vpack.c.bf16 %v261_v18, %v260_v17  ;;  %v234_v27 = vld [vmem:[%s1070_s5 + $0xb0] sm:$0xff]  ;;  %v781_v29 = vpack.c.bf16 %v263_v26, %v262_v25 }
  0x21   : > { %v779_v23 = vpack.c.bf16 %v245_v20, %v244_v19  ;;  %v217_v24 = vld [vmem:[%s1070_s5 + $0x28] sm:$0xff]  ;;  %v235_v28 = vld [vmem:[%s1070_s5 + $0xb8] sm:$0xff]  ;;  %v246_v31 = vld [vmem:[%s1070_s5 + $0x110] sm:$0xff] }
  0x22   : > { %778 = vmatprep.subr.bf16.mxu1 %v777_v22  ;;  %v755_v30 = vpack.c.bf16 %v217_v24, %v216_v21  ;;  %v247_v32 = vld [vmem:[%s1070_s5 + $0x118] sm:$0xff]  ;;  %v757_v33 = vpack.c.bf16 %v235_v28, %v234_v27  ;;  %v264_v34 = vld [vmem:[%s1070_s5 + $0x1a0] sm:$0xff]  ;;  %v265_v35 = vld [vmem:[%s1070_s5 + $0x1a8] sm:$0xff] }
  0x23   : > { %780 = vmatpush3.bf16.xpose.msra.mxu1 %v779_v23  ;;  %v783_v36 = vpack.c.bf16 %v247_v32, %v246_v31  ;;  %v785_v37 = vpack.c.bf16 %v265_v35, %v264_v34  ;;  %v218_v38 = vld [vmem:[%s1070_s5 + $0x30] sm:$0xff]  ;;  %v219_v39 = vld [vmem:[%s1070_s5 + $0x38] sm:$0xff]  ;;  %v236_v40 = vld [vmem:[%s1070_s5 + $0xc0] sm:$0xff] }
  0x24   : > { %782 = vmatprep.subr.bf16.mxu1 %v781_v29  ;;  %v237_v41 = vld [vmem:[%s1070_s5 + $0xc8] sm:$0xff]  ;;  %v759_v42 = vpack.c.bf16 %v219_v39, %v218_v38  ;;  %v248_v43 = vld [vmem:[%s1070_s5 + $0x120] sm:$0xff]  ;;  %v266_v46 = vld [vmem:[%s1070_s5 + $0x1b0] sm:$0xff] }
  0x25   : > { %v249_v44 = vld [vmem:[%s1070_s5 + $0x128] sm:$0xff]  ;;  %v761_v45 = vpack.c.bf16 %v237_v41, %v236_v40  ;;  %v267_v47 = vld [vmem:[%s1070_s5 + $0x1b8] sm:$0xff]  ;;  %v220_v50 = vld [vmem:[%s1070_s5 + $0x40] sm:$0xff] }
  0x26   : > { %v787_v48 = vpack.c.bf16 %v249_v44, %v248_v43  ;;  %v789_v49 = vpack.c.bf16 %v267_v47, %v266_v46  ;;  %v221_v51 = vld [vmem:[%s1070_s5 + $0x48] sm:$0xff]  ;;  %v238_v52 = vld [vmem:[%s1070_s5 + $0xd0] sm:$0xff]  ;;  %v239_v53 = vld [vmem:[%s1070_s5 + $0xd8] sm:$0xff] }
  0x27   : > { %752 = vmatpush3.bf16.xpose.msra.mxu0 %v751_v15  ;;  %v763_v54 = vpack.c.bf16 %v221_v51, %v220_v50  ;;  %v250_v55 = vld [vmem:[%s1070_s5 + $0x130] sm:$0xff]  ;;  %v251_v56 = vld [vmem:[%s1070_s5 + $0x138] sm:$0xff]  ;;  %v765_v58 = vpack.c.bf16 %v239_v53, %v238_v52  ;;  %v268_v59 = vld [vmem:[%s1070_s5 + $0x1c0] sm:$0xff] }
  0x28   : > { %754 = vmatprep.subr.bf16.mxu0 %v753_v16  ;;  %v269_v60 = vld [vmem:[%s1070_s5 + $0x1c8] sm:$0xff]  ;;  %v791_v61 = vpack.c.bf16 %v251_v56, %v250_v55  ;;  %v222_v63 = vld [vmem:[%s1070_s5 + $0x50] sm:$0xff]  ;;  %v223_v1 = vld [vmem:[%s1070_s5 + $0x58] sm:$0xff] }
  0x29   : > { %v793_v62 = vpack.c.bf16 %v269_v60, %v268_v59  ;;  %v240_v2 = vld [vmem:[%s1070_s5 + $0xe0] sm:$0xff]  ;;  %v241_v3 = vld [vmem:[%s1070_s5 + $0xe8] sm:$0xff]  ;;  %v767_v4 = vpack.c.bf16 %v223_v1, %v222_v63  ;;  %v270_v8 = vld [vmem:[%s1070_s5 + $0x1d0] sm:$0xff] }
  0x2a   : > { %v252_v5 = vld [vmem:[%s1070_s5 + $0x140] sm:$0xff]  ;;  %v253_v6 = vld [vmem:[%s1070_s5 + $0x148] sm:$0xff]  ;;  %v769_v7 = vpack.c.bf16 %v241_v3, %v240_v2  ;;  %v271_v9 = vld [vmem:[%s1070_s5 + $0x1d8] sm:$0xff] }
  0x2b   : > { %784 = vmatpush3.bf16.xpose.msra.mxu1 %v783_v36  ;;  %v795_v10 = vpack.c.bf16 %v253_v6, %v252_v5  ;;  %v797_v11 = vpack.c.bf16 %v271_v9, %v270_v8  ;;  %v224_v12 = vld [vmem:[%s1070_s5 + $0x60] sm:$0xff]  ;;  %v225_v13 = vld [vmem:[%s1070_s5 + $0x68] sm:$0xff]  ;;  %v242_v14 = vld [vmem:[%s1070_s5 + $0xf0] sm:$0xff] }
  0x2c   : > { %786 = vmatprep.subr.bf16.mxu1 %v785_v37  ;;  %v243_v15 = vld [vmem:[%s1070_s5 + $0xf8] sm:$0xff]  ;;  %v771_v16 = vpack.c.bf16 %v225_v13, %v224_v12  ;;  %v254_v17 = vld [vmem:[%s1070_s5 + $0x150] sm:$0xff]  ;;  %v272_v20 = vld [vmem:[%s1070_s5 + $0x1e0] sm:$0xff] }
  0x2d   : > { %v255_v18 = vld [vmem:[%s1070_s5 + $0x158] sm:$0xff]  ;;  %v773_v19 = vpack.c.bf16 %v243_v15, %v242_v14  ;;  %v273_v21 = vld [vmem:[%s1070_s5 + $0x1e8] sm:$0xff]  ;;  %v226_v24 = vld [vmem:[%s1070_s5 + $0x70] sm:$0xff] }
  0x2e   : > { %v799_v22 = vpack.c.bf16 %v255_v18, %v254_v17  ;;  %v801_v23 = vpack.c.bf16 %v273_v21, %v272_v20  ;;  %v227_v25 = vld [vmem:[%s1070_s5 + $0x78] sm:$0xff]  ;;  %v292_v26 = vld [vmem:[%s1070_s5 + $0x280] sm:$0xff]  ;;  %v293_v27 = vld [vmem:[%s1070_s5 + $0x288] sm:$0xff] }
  0x2f   : > { %756 = vmatpush3.bf16.xpose.msra.mxu0 %v755_v30  ;;  %v775_v28 = vpack.c.bf16 %v227_v25, %v226_v24  ;;  %v256_v29 = vld [vmem:[%s1070_s5 + $0x160] sm:$0xff]  ;;  %v257_v30 = vld [vmem:[%s1070_s5 + $0x168] sm:$0xff]  ;;  %v809_v31 = vpack.c.bf16 %v293_v27, %v292_v26  ;;  %v274_v32 = vld [vmem:[%s1070_s5 + $0x1f0] sm:$0xff] }
  0x30   : > { %758 = vmatprep.subr.bf16.mxu0 %v757_v33  ;;  %v275_v33 = vld [vmem:[%s1070_s5 + $0x1f8] sm:$0xff]  ;;  %v803_v34 = vpack.c.bf16 %v257_v30, %v256_v29  ;;  %v276_v36 = vld [vmem:[%s1070_s5 + $0x200] sm:$0xff]  ;;  %v277_v37 = vld [vmem:[%s1070_s5 + $0x208] sm:$0xff] }
  0x31   : > { %v805_v35 = vpack.c.bf16 %v275_v33, %v274_v32  ;;  %v294_v38 = vld [vmem:[%s1070_s5 + $0x290] sm:$0xff]  ;;  %v295_v39 = vld [vmem:[%s1070_s5 + $0x298] sm:$0xff]  ;;  %v811_v40 = vpack.c.bf16 %v277_v37, %v276_v36  ;;  %v296_v47 = vld [vmem:[%s1070_s5 + $0x2a0] sm:$0xff] }
  0x32   : > { %v258_v41 = vld [vmem:[%s1070_s5 + $0x170] sm:$0xff]  ;;  %v813_v43 = vpack.c.bf16 %v295_v39, %v294_v38  ;;  %v279_v46 = vld [vmem:[%s1070_s5 + $0x218] sm:$0xff]  ;;  %v280_v51 = vld [vmem:[%s1070_s5 + $0x220] sm:$0xff] }
  0x33   : > { %788 = vmatpush3.bf16.xpose.msra.mxu1 %v787_v48  ;;  %v297_v48 = vld [vmem:[%s1070_s5 + $0x2a8] sm:$0xff]  ;;  %v298_v53 = vld [vmem:[%s1070_s5 + $0x2b0] sm:$0xff]  ;;  %v300_v59 = vld [vmem:[%s1070_s5 + $0x2c0] sm:$0xff] }
  0x34   : > { %790 = vmatprep.subr.bf16.mxu1 %v789_v49  ;;  %v817_v50 = vpack.c.bf16 %v297_v48, %v296_v47  ;;  %v281_v52 = vld [vmem:[%s1070_s5 + $0x228] sm:$0xff]  ;;  %v282_v57 = vld [vmem:[%s1070_s5 + $0x230] sm:$0xff]  ;;  %v284_v63 = vld [vmem:[%s1070_s5 + $0x240] sm:$0xff] }
  0x35   : > { %v819_v55 = vpack.c.bf16 %v281_v52, %v280_v51  ;;  %v301_v60 = vld [vmem:[%s1070_s5 + $0x2c8] sm:$0xff]  ;;  %v302_v2 = vld [vmem:[%s1070_s5 + $0x2d0] sm:$0xff]  ;;  %v303_v3 = vld [vmem:[%s1070_s5 + $0x2d8] sm:$0xff] }
  0x36   : > { %v285_v1 = vld [vmem:[%s1070_s5 + $0x248] sm:$0xff]  ;;  %v829_v5 = vpack.c.bf16 %v303_v3, %v302_v2  ;;  %v286_v6 = vld [vmem:[%s1070_s5 + $0x250] sm:$0xff]  ;;  %v304_v8 = vld [vmem:[%s1070_s5 + $0x2e0] sm:$0xff] }
  0x37   : > { %760 = vmatpush3.bf16.xpose.msra.mxu0 %v759_v42  ;;  %v259_v42 = vld [vmem:[%s1070_s5 + $0x178] sm:$0xff]  ;;  %v305_v9 = vld [vmem:[%s1070_s5 + $0x2e8] sm:$0xff]  ;;  %v288_v12 = vld [vmem:[%s1070_s5 + $0x260] sm:$0xff] }
  0x38   : > { %762 = vmatprep.subr.bf16.mxu0 %v761_v45  ;;  %v807_v44 = vpack.c.bf16 %v259_v42, %v258_v41  ;;  %v278_v45 = vld [vmem:[%s1070_s5 + $0x210] sm:$0xff]  ;;  %v289_v13 = vld [vmem:[%s1070_s5 + $0x268] sm:$0xff]  ;;  %v307_v15 = vld [vmem:[%s1070_s5 + $0x2f8] sm:$0xff] }
  0x39   : > { %v815_v49 = vpack.c.bf16 %v279_v46, %v278_v45  ;;  %v306_v14 = vld [vmem:[%s1070_s5 + $0x2f0] sm:$0xff] }
  0x3a   : > { %v837_v17 = vpack.c.bf16 %v307_v15, %v306_v14  ;;  %v290_v18 = vld [vmem:[%s1070_s5 + $0x270] sm:$0xff] }
  0x3b   : > { %792 = vmatpush3.bf16.xpose.msra.mxu1 %v791_v61 }
  0x3c   : > { %794 = vmatprep.subr.bf16.mxu1 %v793_v62  ;;  %v825_v62 = vpack.c.bf16 %v301_v60, %v300_v59 }
  0x3f   : > { %764 = vmatpush3.bf16.xpose.msra.mxu0 %v763_v54  ;;  %v299_v54 = vld [vmem:[%s1070_s5 + $0x2b8] sm:$0xff] }
  0x40   : > { %766 = vmatprep.subr.bf16.mxu0 %v765_v58  ;;  %v821_v56 = vpack.c.bf16 %v299_v54, %v298_v53  ;;  %v283_v58 = vld [vmem:[%s1070_s5 + $0x238] sm:$0xff] }
  0x41   : > { %v823_v61 = vpack.c.bf16 %v283_v58, %v282_v57 }
  0x43   : > { %796 = vmatpush3.bf16.xpose.msra.mxu1 %v795_v10 }
  0x44   : > { %798 = vmatprep.subr.bf16.mxu1 %v797_v11  ;;  %v833_v11 = vpack.c.bf16 %v305_v9, %v304_v8 }
  0x47   : > { %768 = vmatpush3.bf16.xpose.msra.mxu0 %v767_v4  ;;  %v827_v4 = vpack.c.bf16 %v285_v1, %v284_v63 }
  0x48   : > { %770 = vmatprep.subr.bf16.mxu0 %v769_v7  ;;  %v287_v7 = vld [vmem:[%s1070_s5 + $0x258] sm:$0xff] }
  0x49   : > { %v831_v10 = vpack.c.bf16 %v287_v7, %v286_v6 }
  0x4b   : > { %800 = vmatpush3.bf16.xpose.msra.mxu1 %v799_v22 }
  0x4c   : > { %802 = vmatprep.subr.bf16.mxu1 %v801_v23 }
  0x4f   : > { %772 = vmatpush3.bf16.xpose.msra.mxu0 %v771_v16  ;;  %v835_v16 = vpack.c.bf16 %v289_v13, %v288_v12 }
  0x50   : > { %774 = vmatprep.subr.bf16.mxu0 %v773_v19  ;;  %v291_v19 = vld [vmem:[%s1070_s5 + $0x278] sm:$0xff] }
  0x51   : > { %v839_v20 = vpack.c.bf16 %v291_v19, %v290_v18 }
  0x53   : > { %804 = vmatpush3.bf16.xpose.msra.mxu1 %v803_v34 }
  0x54   : > { %806 = vmatprep.subr.bf16.mxu1 %v805_v35 }
  0x57   : > { %776 = vmatpush3.bf16.xpose.msra.mxu0 %v775_v28 }
  0x58   : > { %810 = vmatprep.subr.bf16.mxu0 %v809_v31 }
  0x5b   : > { %808 = vmatpush3.bf16.xpose.msra.mxu1 %v807_v44 }
  0x5e   : > { %676 = vmatmul.mubr.f32.vlgmr.msra.gmra.mrb[0].mxu0 %v1062_v0 }
  0x5f   : > { %812 = vmatpush3.bf16.xpose.msra.mxu0 %v811_v40  ;;  %743 = vmatprep.mubr.f32.mxu0 %v1062_v0 }
  0x60   : > { %814 = vmatprep.subr.bf16.mxu0 %v813_v43 }
  0x62   : > { %710 = vmatmul.mubr.f32.vlgmr.msra.gmra.mrb[0].mxu1 %v1062_v0 }
  0x67   : > { %816 = vmatpush3.bf16.xpose.msra.mxu0 %v815_v49 }
  0x68   : > { %818 = vmatprep.subr.bf16.mxu0 %v817_v50 }
  0x6f   : > { %820 = vmatpush3.bf16.xpose.msra.mxu0 %v819_v55 }
  0x70   : > { %822 = vmatprep.subr.bf16.mxu0 %v821_v56 }
  0x77   : > { %824 = vmatpush3.bf16.xpose.msra.mxu0 %v823_v61 }
  0x78   : > { %826 = vmatprep.subr.bf16.mxu0 %v825_v62 }
  0x7f   : > { %828 = vmatpush3.bf16.xpose.msra.mxu0 %v827_v4 }
  0x80   : > { %830 = vmatprep.subr.bf16.mxu0 %v829_v5 }
  0x87   : > { %832 = vmatpush3.bf16.xpose.msra.mxu0 %v831_v10 }
  0x88   : > { %834 = vmatprep.subr.bf16.mxu0 %v833_v11 }
  0x8f   : > { %836 = vmatpush3.bf16.xpose.msra.mxu0 %v835_v16 }
  0x90   : > { %838 = vmatprep.subr.bf16.mxu0 %v837_v17  ;;  %v311_v21 = vpop.permute.xlu0 %310 }
  0x97   : > { %840 = vmatpush3.bf16.xpose.msra.mxu0 %v839_v20 }
  0x9e   : > { %744 = vmatmul.mubr.f32.vlgmr.msra.gmra.mrb[2].mxu0 %v1062_v0 }
 0x131   : > { %v379_v22 = vpop.f32.mrb[0].mxu0 }
 0x132   : > { %v380_v23 = vadd.f32 %v379_v22, %v311_v21  ;;  %v381_v24 = vpop.f32.mrb[1].mxu0 }
 0x133   : > { %v382_v25 = vadd.f32 %v381_v24, %v311_v21 }
 0x135   : > { %v532_v26 = vcombine.low %v380_v23, %v382_v25  ;;  %v450_v27 = vpop.f32.mrb[0].mxu1 }
 0x136   : > { %v451_v28 = vadd.f32 %v450_v27, %v311_v21  ;;  %v452_v29 = vpop.f32.mrb[1].mxu1 }
 0x137   : > { %538 = vst [vmem:[%s194_s10] sm:$0xff] %v532_v26  ;;  %v453_v30 = vadd.f32 %v452_v29, %v311_v21 }
 0x139   : > { %v533_v31 = vcombine.low %v451_v28, %v453_v30 }
 0x13b   : > { %539 = vst [vmem:[%s194_s10 + $0x8] sm:$0xff] %v533_v31 }
 0x171   : > { %v521_v32 = vpop.f32.mrb[2].mxu0 }
 0x172   : > { %v522_v0 = vadd.f32 %v521_v32, %v311_v21  ;;  %v523_v33 = vpop.f32.mrb[3].mxu0 }
 0x173   : > { %v524_v34 = vadd.f32 %v523_v33, %v311_v21 }
 0x175   : > { %v534_v35 = vcombine.low %v522_v0, %v524_v34 }
 0x177   : > { %540 = vst [vmem:[%s194_s10 + $0x10] sm:$0xff] %v534_v35 }
 0x178   : > { %914 = shalt.err (!%p911_p5)
}
 0x179   : > { %s915_s30 = scalar_lea.hbm %s1180_s23, 384  ;;  %s919_s6 = scalar_lea.hbm %s1230_s3, 768 }
 0x17a   : > { %p916_p6 = scmp.ne.s32.totalorder %s1180_s23, %s915_s30  ;;  %p920_p10 = scmp.lt.u32.totalorder %s1180_s23, %s1230_s3 }
 0x17b   : > { %p921_p11 = scmp.lt.u32.totalorder %s919_s6, %s915_s30  ;;  %p923_p13 = scmp.lt.u32.totalorder %s915_s30, %s1180_s23 }
 0x17c   : > { %p917_p7 = pnand %p916_p6, %p1043_p4 }
 0x17d   : > { %p922_p12 = por %p921_p11, %p920_p10 }
 0x17e   : > { %p918_p9 = pneg %p917_p7 }
 0x17f   : > { %p924_p0 = por %p923_p13, %p922_p12 }
 0x181   : > { %p925_p1 = pnand %p924_p0, %p918_p9 }
 0x183   : > { %928 = shalt.err (!%p925_p1)
}
 0x184   : > { %844 = dma.vmem_to_hbm [thread:$0]  (%p1043_p4), %s1182_s18, 384, %s1180_s23, %s542_s26  }
 0x185 PF: > { %p850_p2 = scmp.ge.s32.totalorder %s979_s17, 2  ;;  %s570_s9 = sand.u32 1, %s959_s12  }
 0x186   : > { %s571_s10 = scalar_lea.sflag [#allocation3], %s570_s9 }
 0x187   : > { %p847_p3 = pnand %p850_p2, %p1050_p8 }
 0x189   : > { %954 = dma.done.wait (!%p847_p3), %s571_s10, 384  }
 0x18a   : > { %956 = vsyncadd (!%p847_p3), %s571_s10, 4294966912  ;;  %s16_s17 = sadd.s32 1, %s979_s17   ;;  %s1233_s12 = smov %s963_s13 }
 0x18b   : > { %p13_p5 = scmp.ge.s32.totalorder %s16_s17, 4   ;;  %s1234_s13 = smov %s967_s14 }
 0x18c   : > { %s1235_s14 = smov %s1056_s25  ;;  %s1236_s15 = smov %s975_s16 }
 0x18d   : > { %s1237_s16 = smov %s1239_s20  ;;  %15 = sbr.rel (!%p13_p5) target bundleno = 4 (0x4), region = 67 }
 0x194   :  { %576 = vsyncpa [#allocation3], 1 }
 0x195   :  { %578 = vsyncpa [#allocation3 + $0x1], 1 }

</bundles_post_ra>
